<compile_context>
chip_gen: v7x
topology: tpu7x:2x2x1
jax: 0.10.0
libtpu: 0.0.40
codegen_flags: <defaults>
</compile_context>

<pallas_src>
import functools

import jax
import jax.numpy as jnp
from jax import lax
from jax.experimental import pallas as pl
from jax.experimental.pallas import tpu as pltpu

_LANE = 128
_SUBLANE = 8
_MAX_BM = 4096      # rows per tile -> 4096 * 128 * 4 B = 2 MiB per f32 tile
_NCORES = 2         # v7x has 2 TensorCores; harmless (serial) on v5e/v6e


def _cdiv(a, b):
    return -(-a // b)


def _round_up(a, b):
    return _cdiv(a, b) * b


def _npc_moments_kernel(shifts_ref, p_ref, t_ref, out_ref, *,
                        num_tiles, tiles_per_core, n_valid):
    """Accumulates five shifted raw moments of (p, t) into a per-core slab.

    out_ref : (1, 5, 8, 128) f32, resident across the 'arbitrary' grid axis.
              [0]=sum(p) [1]=sum(t) [2]=sum(p*p) [3]=sum(t*t) [4]=sum(p*t)
              (all of the SHIFTED data; cov/var are shift-invariant.)
    """
    c = pl.program_id(0)            # core (parallel axis)
    j = pl.program_id(1)            # tile within this core (arbitrary axis)
    g = c * tiles_per_core + j      # global tile id

    @pl.when(j == 0)
    def _init():
        out_ref[...] = jnp.zeros_like(out_ref)

    shift_p = shifts_ref[0]
    shift_t = shifts_ref[1]

    # Load at native dtype, cast once in-register (halves HBM traffic for
    # 16-bit inputs).
    p = p_ref[...].astype(jnp.float32)
    t = t_ref[...].astype(jnp.float32)
    bm = p.shape[0]

    def accumulate(ps, ts):
        # Fold BM rows into one (8,128) vreg per moment: pure VPU adds/muls.
        # The expensive cross-lane reduction happens once, in the wrapper.
        p3 = ps.reshape(bm // _SUBLANE, _SUBLANE, _LANE)
        t3 = ts.reshape(bm // _SUBLANE, _SUBLANE, _LANE)
        out_ref[0, 0] += jnp.sum(p3, axis=0)
        out_ref[0, 1] += jnp.sum(t3, axis=0)
        out_ref[0, 2] += jnp.sum(p3 * p3, axis=0)
        out_ref[0, 3] += jnp.sum(t3 * t3, axis=0)
        out_ref[0, 4] += jnp.sum(p3 * t3, axis=0)

    last = num_tiles - 1

    @pl.when(g < last)
    def _hot():                      # fully-valid tile: no masking
        accumulate(p - shift_p, t - shift_t)

    @pl.when(g >= last)
    def _tail():
        # Last real tile (ragged tail + Pallas OOB block padding) and any
        # phantom tile of the second core: mask invalid elements BEFORE any
        # multiply (the padding region may hold arbitrary garbage, incl. NaN).
        rows_full = n_valid // _LANE          # rows that are fully valid
        lanes_rem = n_valid % _LANE           # valid lanes in the next row
        row_ids = g * bm + lax.broadcasted_iota(jnp.int32, (bm, _LANE), 0)
        lane_ids = lax.broadcasted_iota(jnp.int32, (bm, _LANE), 1)
        mask = (row_ids < rows_full) | (
            (row_ids == rows_full) & (lane_ids < lanes_rem))
        accumulate(jnp.where(mask, p - shift_p, 0.0),
                   jnp.where(mask, t - shift_t, 0.0))


def negative_pearson_correlation(y_pred, y_true, *, max_rows_per_tile=_MAX_BM):
    """JAX/Pallas equivalent of NegativePearsonCorrelation.forward."""
    p = jnp.reshape(y_pred, (-1,))
    t = jnp.reshape(y_true, (-1,))
    n = p.shape[0]
    assert n > 0, "empty input"

    # Lane-dense 2-D view (rows, 128) at native dtype.  Pad only to the next
    # lane boundary when N is not a multiple of 128 (<128 extra elements);
    # everything else ragged is masked inside the kernel.
    rows = _cdiv(n, _LANE)
    n_lane = rows * _LANE
    if n_lane != n:
        p = jnp.pad(p, (0, n_lane - n))
        t = jnp.pad(t, (0, n_lane - n))
    p2 = p.reshape(rows, _LANE)
    t2 = t.reshape(rows, _LANE)

    bm = _round_up(min(max_rows_per_tile, rows), 16)   # 16: bf16 sublane pack
    num_tiles = _cdiv(rows, bm)
    tiles_per_core = _cdiv(num_tiles, _NCORES)

    # Global shift (first elements) -> cancellation-free moment accumulation.
    shifts = jnp.stack([p[0], t[0]]).astype(jnp.float32)

    def tile_map(c, j):
        # Clamp phantom tiles of the last core onto a real block (their
        # contribution is masked to zero inside the kernel).
        return (jnp.minimum(c * tiles_per_core + j, num_tiles - 1), 0)

    kernel = functools.partial(
        _npc_moments_kernel,
        num_tiles=num_tiles,
        tiles_per_core=tiles_per_core,
        n_valid=n,
    )

    partials = pl.pallas_call(
        kernel,
        out_shape=jax.ShapeDtypeStruct((_NCORES, 5, _SUBLANE, _LANE),
                                       jnp.float32),
        grid_spec=pltpu.PrefetchScalarGridSpec(
            num_scalar_prefetch=0,
            grid=(_NCORES, tiles_per_core),
            in_specs=[
                pl.BlockSpec(memory_space=pltpu.MemorySpace.SMEM),  # shifts
                pl.BlockSpec((bm, _LANE), tile_map),
                pl.BlockSpec((bm, _LANE), tile_map),
            ],
            out_specs=pl.BlockSpec((1, 5, _SUBLANE, _LANE),
                                   lambda c, j: (c, 0, 0, 0)),
        ),
        compiler_params=pltpu.CompilerParams(
            dimension_semantics=("parallel", "arbitrary"),
            vmem_limit_bytes=32 * 1024 * 1024,
        ),
    )(shifts, p2, t2)

    # Tiny scalar finalize (shift-invariant single-pass formulas).
    moments = jnp.sum(partials, axis=(0, 2, 3))        # (5,)
    s_p, s_t = moments[0], moments[1]
    s_pp, s_tt, s_pt = moments[2], moments[3], moments[4]
    nf = jnp.float32(n)
    cov = s_pt - s_p * s_t / nf
    var_p = jnp.maximum(s_pp - s_p * s_p / nf, 0.0)
    var_t = jnp.maximum(s_tt - s_t * s_t / nf, 0.0)
    pearson = cov / (jnp.sqrt(var_p) * jnp.sqrt(var_t) + 1e-8)
    return -pearson


def _reference(y_pred, y_true):
    # Two-pass form, matching the PyTorch module exactly.
    p = jnp.reshape(y_pred, (-1,)).astype(jnp.float32)
    t = jnp.reshape(y_true, (-1,)).astype(jnp.float32)
    pd = p - jnp.mean(p)
    td = t - jnp.mean(t)
    cov = jnp.sum(pd * td)
    pv = jnp.sum(pd ** 2)
    tv = jnp.sum(td ** 2)
    return -(cov / (jnp.sqrt(pv) * jnp.sqrt(tv) + 1e-8))


if __name__ == "__main__":
    key = jax.random.PRNGKey(0)
    k1, k2, k3, k4 = jax.random.split(key, 4)

    # "1D or 2D with a single value per sample": batch of 200 scalar samples,
    # non-zero mean to exercise the shifted (cancellation-safe) accumulation.
    y_pred = 3.0 + jax.random.normal(k1, (200, 1), dtype=jnp.float32)
    y_true = 3.0 + 0.7 * (y_pred - 3.0) + \
        0.3 * jax.random.normal(k2, (200, 1), dtype=jnp.float32)
    loss = jax.block_until_ready(negative_pearson_correlation(y_pred, y_true))
    ref = _reference(y_pred, y_true)
    assert jnp.allclose(loss, ref, atol=1e-4, rtol=1e-4), (loss, ref)

    # Small multi-tile / dual-core / ragged-tail path (force a tiny tile so
    # both grid cores and the in-kernel tail mask are exercised).
    yp2 = jax.random.normal(k3, (3, 700), dtype=jnp.float32)
    yt2 = 0.5 * yp2 + 0.5 * jax.random.normal(k4, (3, 700), dtype=jnp.float32)
    loss2 = jax.block_until_ready(
        negative_pearson_correlation(yp2, yt2, max_rows_per_tile=16))
    ref2 = _reference(yp2, yt2)
    assert jnp.allclose(loss2, ref2, atol=1e-4, rtol=1e-4), (loss2, ref2)

    print("KERNEL_OK")
</pallas_src>

<mosaic_0001>
module attributes {stable_mosaic.version = 11 : i64} {
  func.func @_npc_moments_kernel(%arg0: i32, %arg1: i32, %arg2: memref<2xf32, #tpu.memory_space<smem>>, %arg3: memref<16x128xf32, #tpu.memory_space<vmem>>, %arg4: memref<16x128xf32, #tpu.memory_space<vmem>>, %arg5: memref<1x5x8x128xf32, #tpu.memory_space<vmem>>) attributes {dimension_semantics = [#tpu.dimension_semantics<parallel>, #tpu.dimension_semantics<arbitrary>], iteration_bounds = array<i64: 2, 1>, scalar_prefetch = 0 : i64, scratch_operands = 0 : i64, tpu.core_type = #tpu.core_type<tc>, window_params = [{transform_indices = @transform_0, window_bounds = array<i64: 2>}, {transform_indices = @transform_1, window_bounds = array<i64: 16, 128>}, {transform_indices = @transform_2, window_bounds = array<i64: 16, 128>}, {transform_indices = @transform_3, window_bounds = array<i64: 1, 5, 8, 128>}]} {
    %c1_i32 = arith.constant 1 : i32
    %0 = arith.muli %arg0, %c1_i32 : i32
    %1 = arith.addi %0, %arg1 : i32
    %c0_i32 = arith.constant 0 : i32
    %2 = arith.cmpi eq, %arg1, %c0_i32 : i32
    %3 = arith.extui %2 : i1 to i32
    %c0_i32_0 = arith.constant 0 : i32
    %4 = arith.cmpi ne, %3, %c0_i32_0 : i32
    scf.if %4 {
      %cst = arith.constant 0.000000e+00 : f32
      %15 = vector.broadcast %cst : f32 to vector<1x5x8x128xf32>
      %c0_9 = arith.constant 0 : index
      %c0_10 = arith.constant 0 : index
      %c0_11 = arith.constant 0 : index
      %c0_12 = arith.constant 0 : index
      %16 = vector.load %arg5[%c0_9, %c0_10, %c0_11, %c0_12] : memref<1x5x8x128xf32, #tpu.memory_space<vmem>>, vector<1x5x8x128xf32>
      tpu.vector_store %arg5[%c0_9, %c0_10, %c0_11, %c0_12], %15 {strides = array<i32>} : memref<1x5x8x128xf32, #tpu.memory_space<vmem>>, vector<1x5x8x128xf32>,
    } else {
    }
    %c0 = arith.constant 0 : index
    %5 = memref.load %arg2[%c0] : memref<2xf32, #tpu.memory_space<smem>>
    %c1 = arith.constant 1 : index
    %6 = memref.load %arg2[%c1] : memref<2xf32, #tpu.memory_space<smem>>
    %c0_1 = arith.constant 0 : index
    %c0_2 = arith.constant 0 : index
    %7 = vector.load %arg3[%c0_1, %c0_2] : memref<16x128xf32, #tpu.memory_space<vmem>>, vector<16x128xf32>
    %c0_3 = arith.constant 0 : index
    %c0_4 = arith.constant 0 : index
    %8 = vector.load %arg4[%c0_3, %c0_4] : memref<16x128xf32, #tpu.memory_space<vmem>>, vector<16x128xf32>
    %c0_i32_5 = arith.constant 0 : i32
    %9 = arith.cmpi slt, %1, %c0_i32_5 : i32
    %10 = arith.extui %9 : i1 to i32
    %c0_i32_6 = arith.constant 0 : i32
    %11 = arith.cmpi ne, %10, %c0_i32_6 : i32
    scf.if %11 {
      %15 = vector.broadcast %5 : f32 to vector<16x128xf32>
      %16 = arith.subf %7, %15 : vector<16x128xf32>
      %17 = vector.broadcast %6 : f32 to vector<16x128xf32>
      %18 = arith.subf %8, %17 : vector<16x128xf32>
      %19 = vector.shape_cast %16 : vector<16x128xf32> to vector<2x8x128xf32>
      %20 = vector.shape_cast %18 : vector<16x128xf32> to vector<2x8x128xf32>
      %c0_9 = arith.constant 0 : index
      %c0_10 = arith.constant 0 : index
      %c0_11 = arith.constant 0 : index
      %c0_12 = arith.constant 0 : index
      %21 = vector.load %arg5[%c0_9, %c0_10, %c0_11, %c0_12] : memref<1x5x8x128xf32, #tpu.memory_space<vmem>>, vector<1x1x8x128xf32>
      %22 = vector.shape_cast %21 : vector<1x1x8x128xf32> to vector<8x128xf32>
      %cst = arith.constant dense<0.000000e+00> : vector<8x128xf32>
      %23 = vector.multi_reduction <add>, %19, %cst [0] : vector<2x8x128xf32> to vector<8x128xf32>
      %24 = arith.addf %22, %23 : vector<8x128xf32>
      %c0_13 = arith.constant 0 : index
      %c0_14 = arith.constant 0 : index
      %c0_15 = arith.constant 0 : index
      %c0_16 = arith.constant 0 : index
      %25 = vector.load %arg5[%c0_13, %c0_14, %c0_15, %c0_16] : memref<1x5x8x128xf32, #tpu.memory_space<vmem>>, vector<1x1x8x128xf32>
      %26 = vector.shape_cast %25 : vector<1x1x8x128xf32> to vector<8x128xf32>
      %27 = vector.shape_cast %24 : vector<8x128xf32> to vector<1x1x8x128xf32>
      tpu.vector_store %arg5[%c0_13, %c0_14, %c0_15, %c0_16], %27 {strides = array<i32>} : memref<1x5x8x128xf32, #tpu.memory_space<vmem>>, vector<1x1x8x128xf32>,
      %c0_17 = arith.constant 0 : index
      %c1_18 = arith.constant 1 : index
      %c0_19 = arith.constant 0 : index
      %c0_20 = arith.constant 0 : index
      %28 = vector.load %arg5[%c0_17, %c1_18, %c0_19, %c0_20] : memref<1x5x8x128xf32, #tpu.memory_space<vmem>>, vector<1x1x8x128xf32>
      %29 = vector.shape_cast %28 : vector<1x1x8x128xf32> to vector<8x128xf32>
      %cst_21 = arith.constant dense<0.000000e+00> : vector<8x128xf32>
      %30 = vector.multi_reduction <add>, %20, %cst_21 [0] : vector<2x8x128xf32> to vector<8x128xf32>
      %31 = arith.addf %29, %30 : vector<8x128xf32>
      %c0_22 = arith.constant 0 : index
      %c1_23 = arith.constant 1 : index
      %c0_24 = arith.constant 0 : index
      %c0_25 = arith.constant 0 : index
      %32 = vector.load %arg5[%c0_22, %c1_23, %c0_24, %c0_25] : memref<1x5x8x128xf32, #tpu.memory_space<vmem>>, vector<1x1x8x128xf32>
      %33 = vector.shape_cast %32 : vector<1x1x8x128xf32> to vector<8x128xf32>
      %34 = vector.shape_cast %31 : vector<8x128xf32> to vector<1x1x8x128xf32>
      tpu.vector_store %arg5[%c0_22, %c1_23, %c0_24, %c0_25], %34 {strides = array<i32>} : memref<1x5x8x128xf32, #tpu.memory_space<vmem>>, vector<1x1x8x128xf32>,
      %c0_26 = arith.constant 0 : index
      %c2 = arith.constant 2 : index
      %c0_27 = arith.constant 0 : index
      %c0_28 = arith.constant 0 : index
      %35 = vector.load %arg5[%c0_26, %c2, %c0_27, %c0_28] : memref<1x5x8x128xf32, #tpu.memory_space<vmem>>, vector<1x1x8x128xf32>
      %36 = vector.shape_cast %35 : vector<1x1x8x128xf32> to vector<8x128xf32>
      %37 = arith.mulf %19, %19 : vector<2x8x128xf32>
      %cst_29 = arith.constant dense<0.000000e+00> : vector<8x128xf32>
      %38 = vector.multi_reduction <add>, %37, %cst_29 [0] : vector<2x8x128xf32> to vector<8x128xf32>
      %39 = arith.addf %36, %38 : vector<8x128xf32>
      %c0_30 = arith.constant 0 : index
      %c2_31 = arith.constant 2 : index
      %c0_32 = arith.constant 0 : index
      %c0_33 = arith.constant 0 : index
      %40 = vector.load %arg5[%c0_30, %c2_31, %c0_32, %c0_33] : memref<1x5x8x128xf32, #tpu.memory_space<vmem>>, vector<1x1x8x128xf32>
      %41 = vector.shape_cast %40 : vector<1x1x8x128xf32> to vector<8x128xf32>
      %42 = vector.shape_cast %39 : vector<8x128xf32> to vector<1x1x8x128xf32>
      tpu.vector_store %arg5[%c0_30, %c2_31, %c0_32, %c0_33], %42 {strides = array<i32>} : memref<1x5x8x128xf32, #tpu.memory_space<vmem>>, vector<1x1x8x128xf32>,
      %c0_34 = arith.constant 0 : index
      %c3 = arith.constant 3 : index
      %c0_35 = arith.constant 0 : index
      %c0_36 = arith.constant 0 : index
      %43 = vector.load %arg5[%c0_34, %c3, %c0_35, %c0_36] : memref<1x5x8x128xf32, #tpu.memory_space<vmem>>, vector<1x1x8x128xf32>
      %44 = vector.shape_cast %43 : vector<1x1x8x128xf32> to vector<8x128xf32>
      %45 = arith.mulf %20, %20 : vector<2x8x128xf32>
      %cst_37 = arith.constant dense<0.000000e+00> : vector<8x128xf32>
      %46 = vector.multi_reduction <add>, %45, %cst_37 [0] : vector<2x8x128xf32> to vector<8x128xf32>
      %47 = arith.addf %44, %46 : vector<8x128xf32>
      %c0_38 = arith.constant 0 : index
      %c3_39 = arith.constant 3 : index
      %c0_40 = arith.constant 0 : index
      %c0_41 = arith.constant 0 : index
      %48 = vector.load %arg5[%c0_38, %c3_39, %c0_40, %c0_41] : memref<1x5x8x128xf32, #tpu.memory_space<vmem>>, vector<1x1x8x128xf32>
      %49 = vector.shape_cast %48 : vector<1x1x8x128xf32> to vector<8x128xf32>
      %50 = vector.shape_cast %47 : vector<8x128xf32> to vector<1x1x8x128xf32>
      tpu.vector_store %arg5[%c0_38, %c3_39, %c0_40, %c0_41], %50 {strides = array<i32>} : memref<1x5x8x128xf32, #tpu.memory_space<vmem>>, vector<1x1x8x128xf32>,
      %c0_42 = arith.constant 0 : index
      %c4 = arith.constant 4 : index
      %c0_43 = arith.constant 0 : index
      %c0_44 = arith.constant 0 : index
      %51 = vector.load %arg5[%c0_42, %c4, %c0_43, %c0_44] : memref<1x5x8x128xf32, #tpu.memory_space<vmem>>, vector<1x1x8x128xf32>
      %52 = vector.shape_cast %51 : vector<1x1x8x128xf32> to vector<8x128xf32>
      %53 = arith.mulf %19, %20 : vector<2x8x128xf32>
      %cst_45 = arith.constant dense<0.000000e+00> : vector<8x128xf32>
      %54 = vector.multi_reduction <add>, %53, %cst_45 [0] : vector<2x8x128xf32> to vector<8x128xf32>
      %55 = arith.addf %52, %54 : vector<8x128xf32>
      %c0_46 = arith.constant 0 : index
      %c4_47 = arith.constant 4 : index
      %c0_48 = arith.constant 0 : index
      %c0_49 = arith.constant 0 : index
      %56 = vector.load %arg5[%c0_46, %c4_47, %c0_48, %c0_49] : memref<1x5x8x128xf32, #tpu.memory_space<vmem>>, vector<1x1x8x128xf32>
      %57 = vector.shape_cast %56 : vector<1x1x8x128xf32> to vector<8x128xf32>
      %58 = vector.shape_cast %55 : vector<8x128xf32> to vector<1x1x8x128xf32>
      tpu.vector_store %arg5[%c0_46, %c4_47, %c0_48, %c0_49], %58 {strides = array<i32>} : memref<1x5x8x128xf32, #tpu.memory_space<vmem>>, vector<1x1x8x128xf32>,
    } else {
    }
    %c0_i32_7 = arith.constant 0 : i32
    %12 = arith.cmpi sge, %1, %c0_i32_7 : i32
    %13 = arith.extui %12 : i1 to i32
    %c0_i32_8 = arith.constant 0 : i32
    %14 = arith.cmpi ne, %13, %c0_i32_8 : i32
    scf.if %14 {
      %c16_i32 = arith.constant 16 : i32
      %15 = arith.muli %1, %c16_i32 : i32
      %16 = tpu.iota {dimensions = array<i32: 0>} : vector<16x128xi32>
      %17 = vector.broadcast %15 : i32 to vector<16x128xi32>
      %18 = arith.addi %17, %16 : vector<16x128xi32>
      %19 = tpu.iota {dimensions = array<i32: 1>} : vector<16x128xi32>
      %c1_i32_9 = arith.constant 1 : i32
      %20 = vector.broadcast %c1_i32_9 : i32 to vector<16x128xi32>
      %21 = arith.cmpi slt, %18, %20 : vector<16x128xi32>
      %c1_i32_10 = arith.constant 1 : i32
      %22 = vector.broadcast %c1_i32_10 : i32 to vector<16x128xi32>
      %23 = arith.cmpi eq, %18, %22 : vector<16x128xi32>
      %c72_i32 = arith.constant 72 : i32
      %24 = vector.broadcast %c72_i32 : i32 to vector<16x128xi32>
      %25 = arith.cmpi slt, %19, %24 : vector<16x128xi32>
      %26 = arith.andi %23, %25 : vector<16x128xi1>
      %27 = arith.ori %21, %26 : vector<16x128xi1>
      %28 = vector.broadcast %5 : f32 to vector<16x128xf32>
      %29 = arith.subf %7, %28 : vector<16x128xf32>
      %cst = arith.constant 0.000000e+00 : f32
      %30 = vector.broadcast %cst : f32 to vector<16x128xf32>
      %31 = arith.select %27, %29, %30 : vector<16x128xi1>, vector<16x128xf32>
      %32 = vector.broadcast %6 : f32 to vector<16x128xf32>
      %33 = arith.subf %8, %32 : vector<16x128xf32>
      %cst_11 = arith.constant 0.000000e+00 : f32
      %34 = vector.broadcast %cst_11 : f32 to vector<16x128xf32>
      %35 = arith.select %27, %33, %34 : vector<16x128xi1>, vector<16x128xf32>
      %36 = vector.shape_cast %31 : vector<16x128xf32> to vector<2x8x128xf32>
      %37 = vector.shape_cast %35 : vector<16x128xf32> to vector<2x8x128xf32>
      %c0_12 = arith.constant 0 : index
      %c0_13 = arith.constant 0 : index
      %c0_14 = arith.constant 0 : index
      %c0_15 = arith.constant 0 : index
      %38 = vector.load %arg5[%c0_12, %c0_13, %c0_14, %c0_15] : memref<1x5x8x128xf32, #tpu.memory_space<vmem>>, vector<1x1x8x128xf32>
      %39 = vector.shape_cast %38 : vector<1x1x8x128xf32> to vector<8x128xf32>
      %cst_16 = arith.constant dense<0.000000e+00> : vector<8x128xf32>
      %40 = vector.multi_reduction <add>, %36, %cst_16 [0] : vector<2x8x128xf32> to vector<8x128xf32>
      %41 = arith.addf %39, %40 : vector<8x128xf32>
      %c0_17 = arith.constant 0 : index
      %c0_18 = arith.constant 0 : index
      %c0_19 = arith.constant 0 : index
      %c0_20 = arith.constant 0 : index
      %42 = vector.load %arg5[%c0_17, %c0_18, %c0_19, %c0_20] : memref<1x5x8x128xf32, #tpu.memory_space<vmem>>, vector<1x1x8x128xf32>
      %43 = vector.shape_cast %42 : vector<1x1x8x128xf32> to vector<8x128xf32>
      %44 = vector.shape_cast %41 : vector<8x128xf32> to vector<1x1x8x128xf32>
      tpu.vector_store %arg5[%c0_17, %c0_18, %c0_19, %c0_20], %44 {strides = array<i32>} : memref<1x5x8x128xf32, #tpu.memory_space<vmem>>, vector<1x1x8x128xf32>,
      %c0_21 = arith.constant 0 : index
      %c1_22 = arith.constant 1 : index
      %c0_23 = arith.constant 0 : index
      %c0_24 = arith.constant 0 : index
      %45 = vector.load %arg5[%c0_21, %c1_22, %c0_23, %c0_24] : memref<1x5x8x128xf32, #tpu.memory_space<vmem>>, vector<1x1x8x128xf32>
      %46 = vector.shape_cast %45 : vector<1x1x8x128xf32> to vector<8x128xf32>
      %cst_25 = arith.constant dense<0.000000e+00> : vector<8x128xf32>
      %47 = vector.multi_reduction <add>, %37, %cst_25 [0] : vector<2x8x128xf32> to vector<8x128xf32>
      %48 = arith.addf %46, %47 : vector<8x128xf32>
      %c0_26 = arith.constant 0 : index
      %c1_27 = arith.constant 1 : index
      %c0_28 = arith.constant 0 : index
      %c0_29 = arith.constant 0 : index
      %49 = vector.load %arg5[%c0_26, %c1_27, %c0_28, %c0_29] : memref<1x5x8x128xf32, #tpu.memory_space<vmem>>, vector<1x1x8x128xf32>
      %50 = vector.shape_cast %49 : vector<1x1x8x128xf32> to vector<8x128xf32>
      %51 = vector.shape_cast %48 : vector<8x128xf32> to vector<1x1x8x128xf32>
      tpu.vector_store %arg5[%c0_26, %c1_27, %c0_28, %c0_29], %51 {strides = array<i32>} : memref<1x5x8x128xf32, #tpu.memory_space<vmem>>, vector<1x1x8x128xf32>,
      %c0_30 = arith.constant 0 : index
      %c2 = arith.constant 2 : index
      %c0_31 = arith.constant 0 : index
      %c0_32 = arith.constant 0 : index
      %52 = vector.load %arg5[%c0_30, %c2, %c0_31, %c0_32] : memref<1x5x8x128xf32, #tpu.memory_space<vmem>>, vector<1x1x8x128xf32>
      %53 = vector.shape_cast %52 : vector<1x1x8x128xf32> to vector<8x128xf32>
      %54 = arith.mulf %36, %36 : vector<2x8x128xf32>
      %cst_33 = arith.constant dense<0.000000e+00> : vector<8x128xf32>
      %55 = vector.multi_reduction <add>, %54, %cst_33 [0] : vector<2x8x128xf32> to vector<8x128xf32>
      %56 = arith.addf %53, %55 : vector<8x128xf32>
      %c0_34 = arith.constant 0 : index
      %c2_35 = arith.constant 2 : index
      %c0_36 = arith.constant 0 : index
      %c0_37 = arith.constant 0 : index
      %57 = vector.load %arg5[%c0_34, %c2_35, %c0_36, %c0_37] : memref<1x5x8x128xf32, #tpu.memory_space<vmem>>, vector<1x1x8x128xf32>
      %58 = vector.shape_cast %57 : vector<1x1x8x128xf32> to vector<8x128xf32>
      %59 = vector.shape_cast %56 : vector<8x128xf32> to vector<1x1x8x128xf32>
      tpu.vector_store %arg5[%c0_34, %c2_35, %c0_36, %c0_37], %59 {strides = array<i32>} : memref<1x5x8x128xf32, #tpu.memory_space<vmem>>, vector<1x1x8x128xf32>,
      %c0_38 = arith.constant 0 : index
      %c3 = arith.constant 3 : index
      %c0_39 = arith.constant 0 : index
      %c0_40 = arith.constant 0 : index
      %60 = vector.load %arg5[%c0_38, %c3, %c0_39, %c0_40] : memref<1x5x8x128xf32, #tpu.memory_space<vmem>>, vector<1x1x8x128xf32>
      %61 = vector.shape_cast %60 : vector<1x1x8x128xf32> to vector<8x128xf32>
      %62 = arith.mulf %37, %37 : vector<2x8x128xf32>
      %cst_41 = arith.constant dense<0.000000e+00> : vector<8x128xf32>
      %63 = vector.multi_reduction <add>, %62, %cst_41 [0] : vector<2x8x128xf32> to vector<8x128xf32>
      %64 = arith.addf %61, %63 : vector<8x128xf32>
      %c0_42 = arith.constant 0 : index
      %c3_43 = arith.constant 3 : index
      %c0_44 = arith.constant 0 : index
      %c0_45 = arith.constant 0 : index
      %65 = vector.load %arg5[%c0_42, %c3_43, %c0_44, %c0_45] : memref<1x5x8x128xf32, #tpu.memory_space<vmem>>, vector<1x1x8x128xf32>
      %66 = vector.shape_cast %65 : vector<1x1x8x128xf32> to vector<8x128xf32>
      %67 = vector.shape_cast %64 : vector<8x128xf32> to vector<1x1x8x128xf32>
      tpu.vector_store %arg5[%c0_42, %c3_43, %c0_44, %c0_45], %67 {strides = array<i32>} : memref<1x5x8x128xf32, #tpu.memory_space<vmem>>, vector<1x1x8x128xf32>,
      %c0_46 = arith.constant 0 : index
      %c4 = arith.constant 4 : index
      %c0_47 = arith.constant 0 : index
      %c0_48 = arith.constant 0 : index
      %68 = vector.load %arg5[%c0_46, %c4, %c0_47, %c0_48] : memref<1x5x8x128xf32, #tpu.memory_space<vmem>>, vector<1x1x8x128xf32>
      %69 = vector.shape_cast %68 : vector<1x1x8x128xf32> to vector<8x128xf32>
      %70 = arith.mulf %36, %37 : vector<2x8x128xf32>
      %cst_49 = arith.constant dense<0.000000e+00> : vector<8x128xf32>
      %71 = vector.multi_reduction <add>, %70, %cst_49 [0] : vector<2x8x128xf32> to vector<8x128xf32>
      %72 = arith.addf %69, %71 : vector<8x128xf32>
      %c0_50 = arith.constant 0 : index
      %c4_51 = arith.constant 4 : index
      %c0_52 = arith.constant 0 : index
      %c0_53 = arith.constant 0 : index
      %73 = vector.load %arg5[%c0_50, %c4_51, %c0_52, %c0_53] : memref<1x5x8x128xf32, #tpu.memory_space<vmem>>, vector<1x1x8x128xf32>
      %74 = vector.shape_cast %73 : vector<1x1x8x128xf32> to vector<8x128xf32>
      %75 = vector.shape_cast %72 : vector<8x128xf32> to vector<1x1x8x128xf32>
      tpu.vector_store %arg5[%c0_50, %c4_51, %c0_52, %c0_53], %75 {strides = array<i32>} : memref<1x5x8x128xf32, #tpu.memory_space<vmem>>, vector<1x1x8x128xf32>,
    } else {
    }
    return
  }
  func.func @transform_0(%arg0: i32, %arg1: i32) -> i32 {
    %c0_i32 = arith.constant 0 : i32
    %c0_i32_0 = arith.constant 0 : i32
    return %c0_i32 : i32
  }
  func.func @transform_1(%arg0: i32, %arg1: i32) -> (i32, i32) {
    %c1_i32 = arith.constant 1 : i32
    %0 = arith.muli %arg0, %c1_i32 : i32
    %1 = arith.addi %0, %arg1 : i32
    %c0_i32 = arith.constant 0 : i32
    %2 = arith.minsi %1, %c0_i32 : i32
    %c0_i32_0 = arith.constant 0 : i32
    %c0_i32_1 = arith.constant 0 : i32
    return %2, %c0_i32_0 : i32, i32
  }
  func.func @transform_2(%arg0: i32, %arg1: i32) -> (i32, i32) {
    %c1_i32 = arith.constant 1 : i32
    %0 = arith.muli %arg0, %c1_i32 : i32
    %1 = arith.addi %0, %arg1 : i32
    %c0_i32 = arith.constant 0 : i32
    %2 = arith.minsi %1, %c0_i32 : i32
    %c0_i32_0 = arith.constant 0 : i32
    %c0_i32_1 = arith.constant 0 : i32
    return %2, %c0_i32_0 : i32, i32
  }
  func.func @transform_3(%arg0: i32, %arg1: i32) -> (i32, i32, i32, i32) {
    %c0_i32 = arith.constant 0 : i32
    %c0_i32_0 = arith.constant 0 : i32
    %c0_i32_1 = arith.constant 0 : i32
    %c0_i32_2 = arith.constant 0 : i32
    return %arg0, %c0_i32, %c0_i32_0, %c0_i32_1 : i32, i32, i32, i32
  }
}

</mosaic_0001>

<bundles_post_ra>
// kernel: tpu_custom_call.1
= control target key start
LH: loop header
LB: loop body
LE: loop exit
PB: predicated region body
PF: predicated region fallthrough
CT: control target
= control target key end

     0   :  { %8 = vsyncpa [#allocation4], 0  ;;  %s926_s0 = inlined_call_operand.hbm [shape: f32[2], index: 0, kind: input, shape index: {}]   ;;  %s927_s1 = inlined_call_operand.vmem [shape: f32[2,128], index: 1, kind: input, shape index: {}]   ;;  %s928_s2 = inlined_call_operand.vmem [shape: f32[2,128], index: 2, kind: input, shape index: {}]   ;;  %s929_s3 = inlined_call_operand.hbm [shape: f32[2,5,8,128], index: 3, kind: output, shape index: {}]  }
   0x1   :  { %9 = vsyncpa [#allocation3], 0 }
   0x2   :  { %11 = vsyncpa [#allocation3 + $0x1], 0  ;;  %s732_s12 = smov 0   ;;  %s734_s13 = smov 0  }
   0x3   :  { %s736_s14 = smov 0   ;;  %s738_s15 = smov 0  }
   0x4   :  { %s740_s16 = smov 0   ;;  %s742_s17 = smov 0  }
   0x5 LB: > { %s505_s18 = sadd.s32 4294967295, %s705_s17   ;;  %s506_s19 = sadd.s32 4294967294, %s705_s17   ;;  %s705_s17 = sphi %s742_s17, %s17_s17   ;;  %s701_s16 = sphi %s740_s16, %s938_s16   ;;  %s697_s15 = sphi %s738_s15, %s937_s15   ;;  %s693_s14 = sphi %s736_s14, %s936_s14   ;;  %s689_s13 = sphi %s734_s13, %s935_s13   ;;  %s685_s12 = sphi %s732_s12, %s934_s12  }
   0x6   : > { %s29_s20 = sadd.s32 1, %s701_s16  ;;  %s121_s21 = sadd.s32 1, %s693_s14 }
   0x7   : > { %p31_p0 = scmp.ge.s32.totalorder %s29_s20, 2  ;;  %p131_p1 = scmp.ne.s32.totalorder %s693_s14, %s689_s13 }
   0x8   : > { %p132_p2 = scmp.eq.s32.totalorder %s505_s18, 1  ;;  %p137_p3 = scmp.ne.s32.totalorder %s689_s13, %s685_s12 }
   0x9   : > { %s940_s20 = smov (%p31_p0, %s29_s20), 0  ;;  %p138_p5 = scmp.eq.s32.totalorder %s506_s19, 1 }
   0xa   : > { %p772_p4 = por %p132_p2, %p131_p1  ;;  %s118_s23 = ssub.s32 %s701_s16, %s940_s20 }
   0xb   : > { %p507_p6 = scmp.ge.s32.totalorder %s705_s17, 1  ;;  %p119_p7 = scmp.eq.s32.totalorder %s118_s23, 0 }
   0xc   : > { %p779_p8 = por %p138_p5, %p137_p3  ;;  %p145_p9 = scmp.lt.s32.totalorder %s705_s17, 3 }
   0xd   : > { %s785_s25 = scalar_select %p119_p7, %s693_s14, %s121_s21  }
   0xe   : > { %p787_p10 = pnand %p507_p6, %p145_p9  ;;  %p791_p11 = scmp.eq.s32.totalorder %s505_s18, 0 }
   0xf   : > { %s610_s30 = scalar_lea.hbm %s926_s0, 16 }
  0x10   : > { %p547_p12 = pneg %p787_p10  ;;  %p611_p0 = scmp.ne.s32.totalorder %s926_s0, %s610_s30 }
  0x11   : > { %p617_p5 = scmp.lt.u32.totalorder %s610_s30, %s926_s0 }
  0x12   : > { %p548_p13 = pnand %p791_p11, %p547_p12 }
  0x14   : > { %p612_p1 = pneg %p548_p13 }
  0x16   : > { %p613_p2 = pnand %p612_p1, %p611_p0 }
  0x18   : > { %p614_p3 = pneg %p613_p2 }
  0x1a   : > { %p619_p6 = pnand %p617_p5, %p614_p3 }
  0x1c   : > { %622 = shalt.err (!%p619_p6)
}
  0x1d   : > { %s707_s8 = smov [#allocation2]   ;;  %207 = sbr.rel (%p787_p10) target bundleno = 107 (0x6b), region = 32 }
  0x1e   : > { %550 = dma.hbm_to_smem (!%p548_p13), %s926_s0, 16, %s707_s8, [#allocation4]  }
  0x24   : > { %676 = dma.done.wait (%p791_p11), [#allocation4], 16  }
  0x25   : > { %678 = vsyncadd (%p791_p11), [#allocation4], 4294967280 }
  0x26   : > { %213 = sfence }
  0x27   : > { %s244_s11 = sand.u32 1, %s689_s13   ;;  %p248_p7 = scmp.lt.s32.totalorder %s697_s15, 0  ;;  %v708_v0 = vmov 0.0  }
  0x28   : > { %s539_s18 = smul.u32 40, %s244_s11  ;;  %s821_s19 = sld [smem:[#allocation2]] }
  0x29   : > { %s249_s21 = scalar_select %p248_p7, %s697_s15, 0 }
  0x2a   : > { %s826_s23 = sld [smem:[#allocation2 + $0x1]]  ;;  %s828_s28 = scalar_lea.vmem [#allocation5], %s539_s18 }
  0x2b   : > { %s512_s26 = sshll.u32 %s249_s21, 3  ;;  %284 = vst [vmem:[%s828_s28] sm:$0xff] %v708_v0  ;;  %285 = vst [vmem:[%s828_s28 + $0x8] sm:$0xff] %v708_v0  ;;  %p517_p10 = scmp.ge.s32.totalorder %s697_s15, 0 }
  0x2c   : > { %286 = vst [vmem:[%s828_s28 + $0x10] sm:$0xff] %v708_v0  ;;  %287 = vst [vmem:[%s828_s28 + $0x18] sm:$0xff] %v708_v0  ;;  %p253_p9 = scmp.lt.s32.totalorder %s512_s26, 0 }
  0x2d   : > { %288 = vst [vmem:[%s828_s28 + $0x20] sm:$0xff] %v708_v0  ;;  %298 = sbr.rel (%p517_p10) target bundleno = 61 (0x3d), region = 44 }
  0x2e   : > { %s942_s26 = smov (!%p253_p9, %s512_s26), 0  ;;  %v299_v5 = vstv (!%p517_p10), %s821_s19 }
  0x2f   : > { %s513_s27 = sshll.u32 %s942_s26, 1 }
  0x30   : > { %s256_s4 = scalar_lea.vmem %s927_s1, %s513_s27  ;;  %s272_s7 = scalar_lea.vmem %s928_s2, %s513_s27  ;;  %v302_v6 = vstv (!%p517_p10), %s826_s23 }
  0x31   : > { %v291_v1 = vld [vmem:[%s256_s4] sm:$0xff]  ;;  %v292_v2 = vld [vmem:[%s256_s4 + $0x8] sm:$0xff] }
  0x32   : > { %v293_v3 = vld [vmem:[%s272_s7] sm:$0xff]  ;;  %v294_v4 = vld [vmem:[%s272_s7 + $0x8] sm:$0xff]  ;;  %v300_v7 = vsub.f32 (!%p517_p10), %v291_v1, %v299_v5  ;;  %v301_v8 = vsub.f32 (!%p517_p10), %v292_v2, %v299_v5  ;;  %v305_v11 = vld [vmem:[%s828_s28] sm:$0xff] (!%p517_p10) }
  0x33   : > { %v303_v9 = vsub.f32 (!%p517_p10), %v293_v3, %v302_v6  ;;  %v304_v10 = vsub.f32 (!%p517_p10), %v294_v4, %v302_v6  ;;  %v518_v12 = vld [vmem:[%s828_s28 + $0x8] sm:$0xff] (!%p517_p10)  ;;  %v520_v17 = vld [vmem:[%s828_s28 + $0x10] sm:$0xff] (!%p517_p10)  ;;  %v522_v25 = vld [vmem:[%s828_s28 + $0x18] sm:$0xff] (!%p517_p10) }
  0x34   : > { %v306_v13 = vadd.f32 %v301_v8, %v300_v7  ;;  %v316_v15 = vmul.f32 %v300_v7, %v300_v7  ;;  %v317_v16 = vmul.f32 %v301_v8, %v301_v8  ;;  %v524_v26 = vld [vmem:[%s828_s28 + $0x20] sm:$0xff] }
  0x35   : > { %v311_v14 = vadd.f32 %v304_v10, %v303_v9  ;;  %v323_v18 = vmul.f32 %v303_v9, %v303_v9  ;;  %v324_v19 = vmul.f32 %v304_v10, %v304_v10  ;;  %v330_v20 = vmul.f32 %v303_v9, %v300_v7 }
  0x36   : > { %v331_v21 = vmul.f32 %v304_v10, %v301_v8  ;;  %v307_v22 = vadd.f32 %v306_v13, %v305_v11  ;;  %v318_v24 = vadd.f32 %v317_v16, %v316_v15 }
  0x37   : > { %v312_v23 = vadd.f32 %v518_v12, %v311_v14  ;;  %v325_v27 = vadd.f32 %v324_v19, %v323_v18 }
  0x38   : > { %v332_v28 = vadd.f32 %v331_v21, %v330_v20  ;;  %308 = vst [vmem:[%s828_s28] sm:$0xff] %v307_v22  ;;  %v319_v29 = vadd.f32 %v520_v17, %v318_v24 }
  0x39   : > { %519 = vst [vmem:[%s828_s28 + $0x8] sm:$0xff] %v312_v23  ;;  %v326_v30 = vadd.f32 %v522_v25, %v325_v27 }
  0x3a   : > { %v333_v31 = vadd.f32 %v524_v26, %v332_v28  ;;  %521 = vst [vmem:[%s828_s28 + $0x10] sm:$0xff] %v319_v29 }
  0x3b   : > { %523 = vst [vmem:[%s828_s28 + $0x18] sm:$0xff] %v326_v30 }
  0x3c   : > { %525 = vst [vmem:[%s828_s28 + $0x20] sm:$0xff] %v333_v31 }
  0x3d PF: > { %338 = sbr.rel (%p248_p7) target bundleno = 81 (0x51), region = 48  ;;  %s527_s8 = sshll.u32 (!%p248_p7), %s697_s15, 4  ;;  %v340_v32 = vlaneseq (!%p248_p7)  ;;  %v357_v36 = vstv (!%p248_p7), %s821_s19  ;;  %v362_v37 = vstv (!%p248_p7), %s826_s23 }
  0x3e   : > { %v343_v33 = vstv (!%p248_p7), %s527_s8  ;;  %v358_v40 = vsub.f32 (!%p248_p7), %v291_v1, %v357_v36  ;;  %v363_v41 = vsub.f32 (!%p248_p7), %v293_v3, %v362_v37  ;;  %v359_v43 = vsub.f32 (!%p248_p7), %v292_v2, %v357_v36 }
  0x3f   : > { %v341_v34 = vshrl.u32 (!%p248_p7), %v340_v32, 7  ;;  %v347_v35 = vand.u32 (!%p248_p7), 127, %v340_v32  ;;  %v364_v44 = vsub.f32 (!%p248_p7), %v294_v4, %v362_v37  ;;  %v367_v50 = vld [vmem:[%s828_s28] sm:$0xff] (!%p248_p7) }
  0x40   : > { %v528_v52 = vld [vmem:[%s828_s28 + $0x8] sm:$0xff] (!%p248_p7) }
  0x41   : > { %v342_v38 = vadd.s32 (!%p248_p7), 8, %v341_v34  ;;  %v344_v39 = vadd.s32 (!%p248_p7), %v343_v33, %v341_v34  ;;  %vm352_vm0 = vcmp.lt.s32.totalorder (!%p248_p7), %v347_v35, 72  ;;  %v530_v58 = vld [vmem:[%s828_s28 + $0x10] sm:$0xff] (!%p248_p7) }
  0x42   : > { %v532_v59 = vld [vmem:[%s828_s28 + $0x18] sm:$0xff] (!%p248_p7) }
  0x43   : > { %v345_v42 = vadd.s32 (!%p248_p7), %v343_v33, %v342_v38  ;;  %vm348_vm1 = vcmp.lt.s32.totalorder (!%p248_p7), %v344_v39, 1  ;;  %vm350_vm2 = vcmp.eq.s32.totalorder (!%p248_p7), %v344_v39, 1  ;;  %v534_v1 = vld [vmem:[%s828_s28 + $0x20] sm:$0xff] (!%p248_p7) }
  0x44   : > { %vm353_vm3 = vmand %vm350_vm2, %vm352_vm0 }
  0x45   : > { %vm349_vm4 = vcmp.lt.s32.totalorder %v345_v42, 1  ;;  %vm351_vm5 = vcmp.eq.s32.totalorder %v345_v42, 1  ;;  %vm355_vm6 = vmor %vm348_vm1, %vm353_vm3 }
  0x46   : > { %vm354_vm7 = vmand %vm351_vm5, %vm352_vm0  ;;  %v360_v45 = vsel %vm355_vm6, %v358_v40, 0.0  ;;  %v365_v46 = vsel %vm355_vm6, %v363_v41, 0.0 }
  0x47   : > { %vm356_vm8 = vmor %vm349_vm4, %vm354_vm7  ;;  %v378_v47 = vmul.f32 %v360_v45, %v360_v45  ;;  %v385_v48 = vmul.f32 %v365_v46, %v365_v46  ;;  %v392_v53 = vmul.f32 %v365_v46, %v360_v45 }
  0x48   : > { %v361_v49 = vsel %vm356_vm8, %v359_v43, 0.0  ;;  %v366_v51 = vsel %vm356_vm8, %v364_v44, 0.0 }
  0x49   : > { %v368_v54 = vadd.f32 %v361_v49, %v360_v45  ;;  %v373_v55 = vadd.f32 %v366_v51, %v365_v46  ;;  %v379_v56 = vmul.f32 %v361_v49, %v361_v49  ;;  %v386_v57 = vmul.f32 %v366_v51, %v366_v51 }
  0x4a   : > { %v393_v60 = vmul.f32 %v366_v51, %v361_v49 }
  0x4b   : > { %v369_v61 = vadd.f32 %v368_v54, %v367_v50  ;;  %v374_v62 = vadd.f32 %v528_v52, %v373_v55  ;;  %v380_v63 = vadd.f32 %v379_v56, %v378_v47  ;;  %v387_v0 = vadd.f32 %v386_v57, %v385_v48 }
  0x4c   : > { %v394_v2 = vadd.f32 %v393_v60, %v392_v53 }
  0x4d   : > { %370 = vst [vmem:[%s828_s28] sm:$0xff] %v369_v61  ;;  %529 = vst [vmem:[%s828_s28 + $0x8] sm:$0xff] %v374_v62  ;;  %v381_v3 = vadd.f32 %v530_v58, %v380_v63  ;;  %v388_v4 = vadd.f32 %v532_v59, %v387_v0 }
  0x4e   : > { %v395_v5 = vadd.f32 %v534_v1, %v394_v2 }
  0x4f   : > { %531 = vst [vmem:[%s828_s28 + $0x10] sm:$0xff] %v381_v3  ;;  %533 = vst [vmem:[%s828_s28 + $0x18] sm:$0xff] %v388_v4 }
  0x50   : > { %535 = vst [vmem:[%s828_s28 + $0x20] sm:$0xff] %v395_v5 }
  0x51 PF: > { %s540_s9 = smul.u32 640, %s697_s15  ;;  %s411_s10 = sshll.u32 %s828_s28, 4  ;;  %s876_s10 = int_to_ptr.vmem [resolvable:$true] %s411_s10 }
  0x52   : > { %s880_s23 = scalar_lea.sflag [#allocation3], %s244_s11  ;;  %s623_s26 = scalar_lea.vmem %s876_s10, 640 }
  0x53   : > { %s874_s21 = scalar_lea.hbm %s929_s3, %s540_s9  ;;  %p624_p11 = scmp.ne.s32.totalorder %s876_s10, %s623_s26 }
  0x54   : > { %s709_s15 = smov [#allocation5]  }
  0x55   : > { %p625_p12 = pnand %p624_p11, %p772_p4  ;;  %s627_s28 = sshll.u32 %s709_s15, 4  ;;  %s628_s28 = int_to_ptr.vmem [resolvable:$false] %s627_s28 }
  0x56   : > { %s629_s27 = scalar_lea.vmem %s628_s28, 1280  ;;  %p630_p0 = scmp.lt.s32.totalorder %s876_s10, %s628_s28 }
  0x57   : > { %p626_p13 = pneg %p625_p12  ;;  %p631_p1 = scmp.lt.s32.totalorder %s629_s27, %s623_s26 }
  0x59   : > { %p632_p2 = por %p631_p1, %p630_p0 }
  0x5b   : > { %p633_p3 = pnand %p632_p2, %p626_p13 }
  0x5d   : > { %636 = shalt.err (!%p633_p3)
}
  0x5e   : > { %s637_s11 = scalar_lea.hbm %s874_s21, 640  ;;  %s641_s4 = scalar_lea.hbm %s929_s3, 1280 }
  0x5f   : > { %p638_p5 = scmp.ne.s32.totalorder %s874_s21, %s637_s11  ;;  %p642_p9 = scmp.lt.u32.totalorder %s874_s21, %s929_s3 }
  0x60   : > { %p643_p10 = scmp.lt.u32.totalorder %s641_s4, %s637_s11  ;;  %p645_p12 = scmp.lt.u32.totalorder %s637_s11, %s874_s21 }
  0x61   : > { %p639_p6 = pnand %p638_p5, %p772_p4 }
  0x62   : > { %p644_p11 = por %p643_p10, %p642_p9 }
  0x63   : > { %p640_p7 = pneg %p639_p6 }
  0x64   : > { %p646_p13 = por %p645_p12, %p644_p11 }
  0x66   : > { %p647_p0 = pnand %p646_p13, %p640_p7 }
  0x68   : > { %650 = shalt.err (!%p647_p0)
}
  0x69   : > { %s710_s7 = smov 128   ;;  %s711_s8 = smov 8  }
  0x6a   : > { %545 = dma.vmem_to_hbm [thread:$0]  (%p772_p4), %s876_s10, 640, %s874_s21, %s880_s23, %s710_s7, %s710_s7, %s711_s8  }
  0x6b PF: > { %p557_p1 = scmp.ge.s32.totalorder %s705_s17, 2  ;;  %s426_s9 = sand.u32 1, %s685_s12  }
  0x6c   : > { %s427_s18 = scalar_lea.sflag [#allocation3], %s426_s9 }
  0x6d   : > { %p552_p2 = pnand %p557_p1, %p779_p8 }
  0x6f   : > { %680 = dma.done.wait (!%p552_p2), %s427_s18, 640  }
  0x70   : > { %682 = vsyncadd (!%p552_p2), %s427_s18, 4294966656  ;;  %s17_s17 = sadd.s32 1, %s705_s17   ;;  %s934_s12 = smov %s689_s13 }
  0x71   : > { %p14_p3 = scmp.ge.s32.totalorder %s17_s17, 4   ;;  %s935_s13 = smov %s693_s14 }
  0x72   : > { %s936_s14 = smov %s785_s25  ;;  %s937_s15 = smov %s701_s16 }
  0x73   : > { %s938_s16 = smov %s940_s20  ;;  %16 = sbr.rel (!%p14_p3) target bundleno = 5 (0x5), region = 95 }
  0x7a   :  { %432 = vsyncpa [#allocation3], 1 }
  0x7b   :  { %434 = vsyncpa [#allocation3 + $0x1], 1 }
  0x7c   :  { %435 = vsyncpa [#allocation4], 1 }
  0x7d   :  { %437 = vsyncpa [#allocation4 + $0x1], 1 }

</bundles_post_ra>
